<compile_context>
chip_gen: v6e
topology: v6e:2x2x1
jax: 0.10.0
libtpu: 0.0.40
codegen_flags: <defaults>
</compile_context>

<pallas_src>
import jax
import jax.numpy as jnp
from jax.experimental import pallas as pl
from jax.experimental.pallas import tpu as pltpu


def _make_weighted_sum_kernel(n):
    """Kernel: out = sum_i w[i] * x_i, with w already relu-normalized."""

    def kernel(w_ref, *refs):
        # w_ref: SMEM (n,) f32 ; refs[:n]: VMEM (tm, L) inputs ; refs[n]: output
        xs = refs[:n]
        o_ref = refs[n]
        acc = w_ref[0] * xs[0][...]
        for i in range(1, n):
            acc = acc + w_ref[i] * xs[i][...]
        o_ref[...] = acc

    return kernel


def _choose_lane_width(total):
    """Largest lane width (multiple of 128, <= 2048) dividing `total`,
    preferring one that leaves a sublane-aligned (multiple-of-8) row count."""
    best = None
    for L in (2048, 1024, 512, 256, 128):
        if total % L == 0:
            if best is None:
                best = L
            if (total // L) % 8 == 0:
                return L
    return best


def linear_weighted_avg(w_kernel, inputs, row_tile=512):
    """inputs: list of n identically-shaped float32 NCHW arrays."""
    n = len(inputs)
    shape = inputs[0].shape
    dtype = inputs[0].dtype
    for x in inputs:
        assert x.shape == shape and x.dtype == dtype, "all inputs must match"

    total = 1
    for d in shape:
        total *= d

    # ---- lane-dense 2D layout (reshape of contiguous data is free) ----------
    L = _choose_lane_width(total)
    if L is None:
        # Fallback: total not divisible by 128 — keep last dim as lanes.
        # TODO(synk): add a pad-to-128 path for odd sizes (rare for FPN maps).
        L = shape[-1]
        M = total // L
    else:
        M = total // L

    # ---- VMEM-budgeted row tile ---------------------------------------------
    itemsize = jnp.dtype(dtype).itemsize
    budget_bytes = 16 * 1024 * 1024          # double-buffered working set cap
    max_rows = max(8, budget_bytes // (2 * (n + 1) * L * itemsize))
    tm = min(row_tile, max_rows, M)
    if tm < M:
        tm = max(8, (tm // 8) * 8)
        while tm > 8 and M % tm != 0:
            tm -= 8
        if M % tm != 0:
            tm = M                           # no clean divisor: single block

    # ---- weights: relu + normalize once, in plain JAX (O(n) scalars) --------
    relu_w = jnp.maximum(w_kernel.astype(jnp.float32), 0.0)
    weights = relu_w / (jnp.sum(relu_w) + 1e-4) * jnp.float32(n)

    xs2d = [x.reshape(M, L) for x in inputs]

    block = pl.BlockSpec((tm, L), lambda i: (i, 0))
    out = pl.pallas_call(
        _make_weighted_sum_kernel(n),
        out_shape=jax.ShapeDtypeStruct((M, L), dtype),
        grid_spec=pltpu.PrefetchScalarGridSpec(
            num_scalar_prefetch=0,
            grid=(M // tm,),
            in_specs=[pl.BlockSpec(memory_space=pltpu.MemorySpace.SMEM)]  # weights
                     + [pl.BlockSpec((tm, L), lambda i: (i, 0)) for _ in range(n)],
            out_specs=block,
        ),
        compiler_params=pltpu.CompilerParams(
            dimension_semantics=("parallel",),
            vmem_limit_bytes=32 * 1024 * 1024,
        ),
    )(weights, *xs2d)
    return out.reshape(shape)


def _reference(w_kernel, inputs):
    n = len(inputs)
    relu_w = jnp.maximum(w_kernel, 0.0)
    weights = relu_w / (jnp.sum(relu_w) + 1e-4) * n
    res = 0.0
    for i in range(n):
        res = res + weights[i] * inputs[i]
    return res


if __name__ == "__main__":
    key = jax.random.PRNGKey(0)
    n_inputs = 3
    N, C, H, W = 2, 4, 16, 16

    # Module init is torch.ones(n_inputs); perturb deterministically so the
    # normalization is nontrivial.
    kw, *kxs = jax.random.split(key, n_inputs + 1)
    w_kernel = jnp.ones((n_inputs,), jnp.float32) + 0.1 * jax.random.normal(
        kw, (n_inputs,), jnp.float32)
    inputs = [jax.random.normal(k, (N, C, H, W), jnp.float32) for k in kxs]

    out = linear_weighted_avg(w_kernel, inputs)
    out = jax.block_until_ready(out)

    ref = _reference(w_kernel, inputs)
    assert out.shape == (N, C, H, W)
    assert jnp.allclose(out, ref, atol=1e-5, rtol=1e-5)
    print("KERNEL_OK")
</pallas_src>

<mosaic_0001>
module attributes {stable_mosaic.version = 11 : i64} {
  func.func @kernel(%arg0: i32, %arg1: memref<3xf32, #tpu.memory_space<smem>>, %arg2: memref<8x256xf32, #tpu.memory_space<vmem>>, %arg3: memref<8x256xf32, #tpu.memory_space<vmem>>, %arg4: memref<8x256xf32, #tpu.memory_space<vmem>>, %arg5: memref<8x256xf32, #tpu.memory_space<vmem>>) attributes {dimension_semantics = [#tpu.dimension_semantics<parallel>], iteration_bounds = array<i64: 1>, scalar_prefetch = 0 : i64, scratch_operands = 0 : i64, tpu.core_type = #tpu.core_type<tc>, window_params = [{transform_indices = @transform_0, window_bounds = array<i64: 3>}, {transform_indices = @transform_1, window_bounds = array<i64: 8, 256>}, {transform_indices = @transform_2, window_bounds = array<i64: 8, 256>}, {transform_indices = @transform_3, window_bounds = array<i64: 8, 256>}, {transform_indices = @transform_4, window_bounds = array<i64: 8, 256>}]} {
    %c0 = arith.constant 0 : index
    %0 = memref.load %arg1[%c0] : memref<3xf32, #tpu.memory_space<smem>>
    %c0_0 = arith.constant 0 : index
    %c0_1 = arith.constant 0 : index
    %1 = vector.load %arg2[%c0_0, %c0_1] : memref<8x256xf32, #tpu.memory_space<vmem>>, vector<8x256xf32>
    %2 = vector.broadcast %0 : f32 to vector<8x256xf32>
    %3 = arith.mulf %2, %1 : vector<8x256xf32>
    %c1 = arith.constant 1 : index
    %4 = memref.load %arg1[%c1] : memref<3xf32, #tpu.memory_space<smem>>
    %c0_2 = arith.constant 0 : index
    %c0_3 = arith.constant 0 : index
    %5 = vector.load %arg3[%c0_2, %c0_3] : memref<8x256xf32, #tpu.memory_space<vmem>>, vector<8x256xf32>
    %6 = vector.broadcast %4 : f32 to vector<8x256xf32>
    %7 = arith.mulf %6, %5 : vector<8x256xf32>
    %8 = arith.addf %3, %7 : vector<8x256xf32>
    %c2 = arith.constant 2 : index
    %9 = memref.load %arg1[%c2] : memref<3xf32, #tpu.memory_space<smem>>
    %c0_4 = arith.constant 0 : index
    %c0_5 = arith.constant 0 : index
    %10 = vector.load %arg4[%c0_4, %c0_5] : memref<8x256xf32, #tpu.memory_space<vmem>>, vector<8x256xf32>
    %11 = vector.broadcast %9 : f32 to vector<8x256xf32>
    %12 = arith.mulf %11, %10 : vector<8x256xf32>
    %13 = arith.addf %8, %12 : vector<8x256xf32>
    %c0_6 = arith.constant 0 : index
    %c0_7 = arith.constant 0 : index
    %14 = vector.load %arg5[%c0_6, %c0_7] : memref<8x256xf32, #tpu.memory_space<vmem>>, vector<8x256xf32>
    tpu.vector_store %arg5[%c0_6, %c0_7], %13 {strides = array<i32>} : memref<8x256xf32, #tpu.memory_space<vmem>>, vector<8x256xf32>,
    return
  }
  func.func @transform_0(%arg0: i32) -> i32 {
    %c0_i32 = arith.constant 0 : i32
    %c0_i32_0 = arith.constant 0 : i32
    return %c0_i32 : i32
  }
  func.func @transform_1(%arg0: i32) -> (i32, i32) {
    %c0_i32 = arith.constant 0 : i32
    %c0_i32_0 = arith.constant 0 : i32
    return %arg0, %c0_i32 : i32, i32
  }
  func.func @transform_2(%arg0: i32) -> (i32, i32) {
    %c0_i32 = arith.constant 0 : i32
    %c0_i32_0 = arith.constant 0 : i32
    return %arg0, %c0_i32 : i32, i32
  }
  func.func @transform_3(%arg0: i32) -> (i32, i32) {
    %c0_i32 = arith.constant 0 : i32
    %c0_i32_0 = arith.constant 0 : i32
    return %arg0, %c0_i32 : i32, i32
  }
  func.func @transform_4(%arg0: i32) -> (i32, i32) {
    %c0_i32 = arith.constant 0 : i32
    %c0_i32_0 = arith.constant 0 : i32
    return %arg0, %c0_i32 : i32, i32
  }
}

</mosaic_0001>

<bundles_post_ra>
// kernel: tpu_custom_call.1
= control target key start
LH: loop header
LB: loop body
LE: loop exit
PB: predicated region body
PF: predicated region fallthrough
CT: control target
= control target key end

     0   :  { %9 = vsyncpa [#allocation5], 0  ;;  %s253_s0 = inlined_call_operand.hbm [shape: f32[3], index: 0, kind: input, shape index: {}]   ;;  %s254_s1 = inlined_call_operand.hbm [shape: f32[8,256], index: 1, kind: input, shape index: {}]   ;;  %s255_s2 = inlined_call_operand.hbm [shape: f32[8,256], index: 2, kind: input, shape index: {}]   ;;  %s256_s3 = inlined_call_operand.hbm [shape: f32[8,256], index: 3, kind: input, shape index: {}]   ;;  %s257_s4 = inlined_call_operand.hbm [shape: f32[8,256], index: 4, kind: output, shape index: {}]  }
   0x1   :  { %10 = vsyncpa [#allocation3], 0 }
   0x2   :  { %11 = vsyncpa [#allocation8], 0 }
   0x3   :  { %12 = vsyncpa [#allocation4], 0  ;;  %s208_s15 = smov [#allocation7]   ;;  %s209_s17 = smov [#allocation6]  }
   0x4   :  { %s37_s16 = sshll.u32 %s208_s15, 4  ;;  %s27_s18 = sshll.u32 %s209_s17, 4  ;;  %s38_s16 = int_to_ptr.vmem [resolvable:$true] %s37_s16  ;;  %s28_s18 = int_to_ptr.vmem [resolvable:$true] %s27_s18 }
   0x5   :  { %s120_s19 = scalar_lea.vmem %s38_s16, 256  ;;  %p125_p1 = scmp.lt.s32.totalorder %s38_s16, %s38_s16 }
   0x6   :  { %p121_p0 = scmp.ne.s32.totalorder %s38_s16, %s120_s19  ;;  %p126_p2 = scmp.lt.s32.totalorder %s120_s19, %s120_s19 }
   0x8   :  { %p127_p3 = por %p126_p2, %p125_p1 }
   0xa   :  { %p128_p4 = pnand %p127_p3, %p121_p0 }
   0xc   :  { %131 = shalt.err (!%p128_p4)
}
   0xd   :  { %40 = dma.hbm_to_vmem [thread:$0]  %s255_s2, 256, %s38_s16, [#allocation8]  }
   0xe   :  { %s210_s22 = smov [#allocation2]   ;;  %s148_s25 = scalar_lea.vmem %s28_s18, 256 }
   0xf   :  { %20 = dma.hbm_to_smem %s253_s0, 16, %s210_s22, [#allocation5]  }
  0x10   :  { %p149_p5 = scmp.ne.s32.totalorder %s28_s18, %s148_s25  ;;  %p153_p6 = scmp.lt.s32.totalorder %s28_s18, %s28_s18 }
  0x11   :  { %p154_p7 = scmp.lt.s32.totalorder %s148_s25, %s148_s25 }
  0x13   :  { %p155_p8 = por %p154_p7, %p153_p6 }
  0x15   :  { %p156_p9 = pnand %p155_p8, %p149_p5 }
  0x17   :  { %159 = shalt.err (!%p156_p9)
}
  0x18   :  { %30 = dma.hbm_to_vmem [thread:$0]  %s254_s1, 256, %s28_s18, [#allocation3]  }
  0x19   :  { %s211_s28 = smov [#allocation9]  }
  0x1a   :  { %s47_s29 = sshll.u32 %s211_s28, 4  ;;  %s48_s29 = int_to_ptr.vmem [resolvable:$true] %s47_s29 }
  0x1b   :  { %s168_s2 = scalar_lea.vmem %s48_s29, 256  ;;  %p173_p11 = scmp.lt.s32.totalorder %s48_s29, %s48_s29 }
  0x1c   :  { %p169_p10 = scmp.ne.s32.totalorder %s48_s29, %s168_s2  ;;  %p174_p12 = scmp.lt.s32.totalorder %s168_s2, %s168_s2 }
  0x1e   :  { %p175_p13 = por %p174_p12, %p173_p11 }
  0x20   :  { %p176_p0 = pnand %p175_p13, %p169_p10 }
  0x22   :  { %179 = shalt.err (!%p176_p0)
}
  0x23   :  { %50 = dma.hbm_to_vmem [thread:$0]  %s256_s3, 256, %s48_s29, [#allocation8]  }
  0x24   :  { %200 = dma.done.wait [#allocation5], 16  }
  0x25   :  { %201 = vsyncadd [#allocation5], 4294967280 }
  0x26   :  { %202 = dma.done.wait [#allocation3], 256  }
  0x27   :  { %203 = vsyncadd [#allocation3], 4294967040 }
  0x28   :  { %204 = dma.done.wait [#allocation8], 512  }
  0x29   :  { %205 = vsyncadd [#allocation8], 4294966784 }
  0x2a   :  { %63 = sfence }
  0x2b   :  { %s64_s1 = sld [smem:[#allocation2]]  ;;  %v65_v0 = vld [vmem:[#allocation6] sm:$0xff]  ;;  %v66_v1 = vld [vmem:[#allocation6 + $0x8] sm:$0xff]  ;;  %v71_v2 = vld [vmem:[#allocation7] sm:$0xff]  ;;  %s212_s3 = smov [#allocation10]  }
  0x2c   :  { %s105_s5 = sld [smem:[#allocation2 + $0x1]]  ;;  %v72_v3 = vld [vmem:[#allocation7 + $0x8] sm:$0xff]  ;;  %v79_v5 = vld [vmem:[#allocation9] sm:$0xff]  ;;  %v80_v6 = vld [vmem:[#allocation9 + $0x8] sm:$0xff]  ;;  %s94_s7 = sshll.u32 %s212_s3, 4  ;;  %s95_s7 = int_to_ptr.vmem [resolvable:$true] %s94_s7 }
  0x2d   :  { %s106_s6 = sld [smem:[#allocation2 + $0x2]]  ;;  %s180_s8 = scalar_lea.vmem %s95_s7, 256 }
  0x2e   :  { %p181_p1 = scmp.ne.s32.totalorder %s95_s7, %s180_s8  ;;  %p185_p2 = scmp.lt.s32.totalorder %s95_s7, %s95_s7 }
  0x2f   :  { %p186_p3 = scmp.lt.s32.totalorder %s180_s8, %s180_s8 }
  0x31   :  { %v67_v4 = vstv %s64_s1  ;;  %p187_p4 = por %p186_p3, %p185_p2 }
  0x32   :  { %v68_v7 = vmul.f32 %v67_v4, %v65_v0  ;;  %v73_v8 = vstv %s105_s5  ;;  %v69_v9 = vmul.f32 %v67_v4, %v66_v1 }
  0x33   :  { %v74_v10 = vmul.f32 %v73_v8, %v71_v2  ;;  %v81_v11 = vstv %s106_s6  ;;  %v75_v12 = vmul.f32 %v73_v8, %v72_v3  ;;  %p188_p5 = pnand %p187_p4, %p181_p1 }
  0x34   :  { %v82_v13 = vmul.f32 %v81_v11, %v79_v5  ;;  %v83_v14 = vmul.f32 %v81_v11, %v80_v6 }
  0x35   :  { %v76_v15 = vadd.f32 %v74_v10, %v68_v7  ;;  %v77_v16 = vadd.f32 %v75_v12, %v69_v9 }
  0x37   :  { %v84_v17 = vadd.f32 %v82_v13, %v76_v15  ;;  %v85_v18 = vadd.f32 %v83_v14, %v77_v16 }
  0x39   :  { %86 = vst [vmem:[#allocation10] sm:$0xff] %v84_v17  ;;  %87 = vst [vmem:[#allocation10 + $0x8] sm:$0xff] %v85_v18 }
  0x3a   :  { %191 = shalt.err (!%p188_p5)
}
  0x3b   :  { %97 = dma.vmem_to_hbm [thread:$0]  %s95_s7, 256, %s257_s4, [#allocation4]  }
  0x3c   :  { %206 = dma.done.wait [#allocation4], 256  }
  0x3d   :  { %207 = vsyncadd [#allocation4], 4294967040 }
  0x3e   :  { %101 = vsyncpa [#allocation3], 1 }
  0x3f   :  { %102 = vsyncpa [#allocation8], 1 }
  0x40   :  { %103 = vsyncpa [#allocation4], 1 }
  0x41   :  { %104 = vsyncpa [#allocation5], 1 }

</bundles_post_ra>
